<compile_context>
chip_gen: v7x
topology: tpu7x:2x2x1
jax: 0.10.0
libtpu: 0.0.40
codegen_flags: <defaults>
</compile_context>

<pallas_src>
import functools

import jax
import jax.numpy as jnp
from jax.experimental import pallas as pl
from jax.experimental.pallas import tpu as pltpu


def matrix_product_kernel(x_ref, m_ref, o_ref, *, n_terms):
    """x_ref: (TILE_B, size)           VMEM activation tile
       m_ref: (n_terms, size, size)    VMEM pre-combined per-term matrices,
                                       already in application order (m_ref[0] first)
       o_ref: (TILE_B, size)           VMEM output tile"""
    # Carry lives in vregs, f32 — no intermediate VMEM stores, no dtype round-trip.
    cur = x_ref[...].astype(jnp.float32)
    for t in range(n_terms):  # static unroll, n_terms is tiny
        cur = jnp.dot(cur.astype(m_ref.dtype), m_ref[t],
                      preferred_element_type=jnp.float32)
    o_ref[...] = cur.astype(o_ref.dtype)  # single store at the end


def matrix_product_forward(x, weights, logit, temperature=1.0, *,
                           mxu_dtype=None, tile_b=None):
    """x: (B, size), weights: (n_factors, size, size) [W_f], logit: (n_terms, n_factors).

    mxu_dtype: e.g. jnp.bfloat16 to feed the MXU in bf16 (f32 accumulation kept).
    tile_b:    batch tile; defaults to min(B, 256)."""
    prob = jax.nn.softmax(logit / temperature, axis=-1).astype(jnp.float32)
    weights_t = jnp.swapaxes(weights, -1, -2).astype(jnp.float32)     # W_f^T

    # Algebraic precombination of the factor mixture (F x fewer kernel matmuls).
    combined = jnp.einsum('tf,fij->tij', prob, weights_t)             # (n_terms, size, size)
    combined = combined[::-1]              # application order: term n_terms-1 first
    if mxu_dtype is not None:
        combined = combined.astype(mxu_dtype)

    B, size = x.shape
    n_terms = combined.shape[0]

    if tile_b is None:
        tile_b = B if B <= 256 else 256
    grid = (pl.cdiv(B, tile_b),)

    kernel = functools.partial(matrix_product_kernel, n_terms=n_terms)
    return pl.pallas_call(
        kernel,
        out_shape=jax.ShapeDtypeStruct((B, size), x.dtype),
        grid=grid,
        in_specs=[
            pl.BlockSpec((tile_b, size), lambda i: (i, 0)),            # x tile
            pl.BlockSpec((n_terms, size, size), lambda i: (0, 0, 0)),  # weights resident
        ],
        out_specs=pl.BlockSpec((tile_b, size), lambda i: (i, 0)),
        compiler_params=pltpu.CompilerParams(
            dimension_semantics=("parallel",),                         # v7x: split batch over 2 TCs
        ),
    )(x, combined)


def matrix_product_reference(x, weights, logit, temperature=1.0):
    """Pure-JAX reference mirroring the PyTorch forward exactly."""
    prob = jax.nn.softmax(logit / temperature, axis=-1)
    n_terms, n_factors = prob.shape
    out = x
    for i in reversed(range(n_terms)):
        stack = jnp.stack([out @ weights[f].T for f in range(n_factors)])  # (F, B, size)
        out = jnp.einsum('f,fbs->bs', prob[i], stack)
    return out


if __name__ == "__main__":
    key = jax.random.PRNGKey(0)
    k_logit, k_w, k_x = jax.random.split(key, 3)

    B = 8            # batch
    size = 32        # feature size of each factor matrix (size x size)
    n_factors = 3
    n_terms = 3      # n_terms defaults to len(factors) in the module

    # Deterministic parameter init (mirrors torch.randn shapes in __init__).
    logit = jax.random.normal(k_logit, (n_terms, n_factors), dtype=jnp.float32)
    weights = jax.random.normal(k_w, (n_factors, size, size), dtype=jnp.float32) / jnp.sqrt(size)
    x = jax.random.normal(k_x, (B, size), dtype=jnp.float32)

    out = matrix_product_forward(x, weights, logit, temperature=1.0)
    out = jax.block_until_ready(out)

    ref = matrix_product_reference(x, weights, logit, temperature=1.0)
    assert out.shape == ref.shape == (B, size)
    assert jnp.allclose(out, ref, rtol=1e-2, atol=1e-2), "kernel mismatch vs reference"

    # TODO(synk): complex=True path (complex_matmul) and sparsemax are not implemented.
    print("KERNEL_OK")
</pallas_src>

<mosaic_0001>
module attributes {stable_mosaic.version = 11 : i64} {
  func.func @matrix_product_kernel(%arg0: i32, %arg1: memref<8x32xf32, #tpu.memory_space<vmem>>, %arg2: memref<3x32x32xf32, #tpu.memory_space<vmem>>, %arg3: memref<8x32xf32, #tpu.memory_space<vmem>>) attributes {dimension_semantics = [#tpu.dimension_semantics<parallel>], iteration_bounds = array<i64: 1>, scalar_prefetch = 0 : i64, scratch_operands = 0 : i64, tpu.core_type = #tpu.core_type<tc>, window_params = [{transform_indices = @transform_0, window_bounds = array<i64: 8, 32>}, {pipeline_mode = #tpu.pipeline_mode<synchronous>, transform_indices = @transform_1, window_bounds = array<i64: 3, 32, 32>}, {transform_indices = @transform_2, window_bounds = array<i64: 8, 32>}]} {
    %c0 = arith.constant 0 : index
    %c0_0 = arith.constant 0 : index
    %0 = vector.load %arg1[%c0, %c0_0] : memref<8x32xf32, #tpu.memory_space<vmem>>, vector<8x32xf32>
    %c0_1 = arith.constant 0 : index
    %c0_2 = arith.constant 0 : index
    %c0_3 = arith.constant 0 : index
    %1 = vector.load %arg2[%c0_1, %c0_2, %c0_3] : memref<3x32x32xf32, #tpu.memory_space<vmem>>, vector<1x32x32xf32>
    %2 = vector.shape_cast %1 : vector<1x32x32xf32> to vector<32x32xf32>
    %cst = arith.constant dense<0.000000e+00> : vector<8x32xf32>
    %3 = tpu.matmul %0, %2, %cst {dimension_numbers = #tpu.dot_dimension_numbers<[1], [0], [0], [1], [0, 0, 1, 1], [], []>} : vector<8x32xf32>, vector<32x32xf32>, vector<8x32xf32> -> vector<8x32xf32>
    %c1 = arith.constant 1 : index
    %c0_4 = arith.constant 0 : index
    %c0_5 = arith.constant 0 : index
    %4 = vector.load %arg2[%c1, %c0_4, %c0_5] : memref<3x32x32xf32, #tpu.memory_space<vmem>>, vector<1x32x32xf32>
    %5 = vector.shape_cast %4 : vector<1x32x32xf32> to vector<32x32xf32>
    %cst_6 = arith.constant dense<0.000000e+00> : vector<8x32xf32>
    %6 = tpu.matmul %3, %5, %cst_6 {dimension_numbers = #tpu.dot_dimension_numbers<[1], [0], [0], [1], [0, 0, 1, 1], [], []>} : vector<8x32xf32>, vector<32x32xf32>, vector<8x32xf32> -> vector<8x32xf32>
    %c2 = arith.constant 2 : index
    %c0_7 = arith.constant 0 : index
    %c0_8 = arith.constant 0 : index
    %7 = vector.load %arg2[%c2, %c0_7, %c0_8] : memref<3x32x32xf32, #tpu.memory_space<vmem>>, vector<1x32x32xf32>
    %8 = vector.shape_cast %7 : vector<1x32x32xf32> to vector<32x32xf32>
    %cst_9 = arith.constant dense<0.000000e+00> : vector<8x32xf32>
    %9 = tpu.matmul %6, %8, %cst_9 {dimension_numbers = #tpu.dot_dimension_numbers<[1], [0], [0], [1], [0, 0, 1, 1], [], []>} : vector<8x32xf32>, vector<32x32xf32>, vector<8x32xf32> -> vector<8x32xf32>
    %c0_10 = arith.constant 0 : index
    %c0_11 = arith.constant 0 : index
    %10 = vector.load %arg3[%c0_10, %c0_11] : memref<8x32xf32, #tpu.memory_space<vmem>>, vector<8x32xf32>
    tpu.vector_store %arg3[%c0_10, %c0_11], %9 {strides = array<i32>} : memref<8x32xf32, #tpu.memory_space<vmem>>, vector<8x32xf32>,
    return
  }
  func.func @transform_0(%arg0: i32) -> (i32, i32) {
    %c0_i32 = arith.constant 0 : i32
    %c0_i32_0 = arith.constant 0 : i32
    return %arg0, %c0_i32 : i32, i32
  }
  func.func @transform_1(%arg0: i32) -> (i32, i32, i32) {
    %c0_i32 = arith.constant 0 : i32
    %c0_i32_0 = arith.constant 0 : i32
    %c0_i32_1 = arith.constant 0 : i32
    %c0_i32_2 = arith.constant 0 : i32
    return %c0_i32, %c0_i32_0, %c0_i32_1 : i32, i32, i32
  }
  func.func @transform_2(%arg0: i32) -> (i32, i32) {
    %c0_i32 = arith.constant 0 : i32
    %c0_i32_0 = arith.constant 0 : i32
    return %arg0, %c0_i32 : i32, i32
  }
}

</mosaic_0001>

<bundles_post_ra>
// kernel: tpu_custom_call.1
= control target key start
LH: loop header
LB: loop body
LE: loop exit
PB: predicated region body
PF: predicated region fallthrough
CT: control target
= control target key end

     0   :  { %7 = vsyncpa [#allocation3], 0  ;;  %s512_s0 = inlined_call_operand.hbm [shape: f32[8,32], index: 0, kind: input, shape index: {}]   ;;  %s513_s1 = inlined_call_operand.hbm [shape: f32[3,32,32], index: 1, kind: input, shape index: {}]   ;;  %s514_s2 = inlined_call_operand.hbm [shape: f32[8,32], index: 2, kind: output, shape index: {}]  }
   0x1   :  { %8 = vsyncpa [#allocation6], 0 }
   0x2   :  { %9 = vsyncpa [#allocation4], 0  ;;  %s439_s9 = smov [#allocation2]   ;;  %s440_s11 = smov [#allocation5]  }
   0x3   :  { %s16_s10 = sshll.u32 %s439_s9, 4  ;;  %s25_s12 = sshll.u32 %s440_s11, 4  ;;  %s17_s10 = int_to_ptr.vmem [resolvable:$true] %s16_s10  ;;  %s462_s12 = int_to_ptr.vmem [resolvable:$true] %s25_s12 }
   0x4   :  { %s367_s15 = scalar_lea.hbm %s512_s0, 128 }
   0x5   :  { %p368_p0 = scmp.ne.s32.totalorder %s512_s0, %s367_s15  ;;  %p371_p1 = scmp.lt.u32.totalorder %s367_s15, %s512_s0 }
   0x7   :  { %p373_p2 = pnand %p371_p1, %p368_p0 }
   0x9   :  { %376 = shalt.err (!%p373_p2)
}
   0xa   :  { %s377_s20 = scalar_lea.vmem %s17_s10, 128  ;;  %p382_p4 = scmp.lt.s32.totalorder %s17_s10, %s17_s10 }
   0xb   :  { %p378_p3 = scmp.ne.s32.totalorder %s17_s10, %s377_s20  ;;  %p383_p5 = scmp.lt.s32.totalorder %s377_s20, %s377_s20 }
   0xd   :  { %p384_p6 = por %p383_p5, %p382_p4 }
   0xf   :  { %p385_p7 = pnand %p384_p6, %p378_p3 }
  0x11   :  { %388 = shalt.err (!%p385_p7)
}
  0x12   :  { %19 = dma.hbm_to_vmem [thread:$0]  %s512_s0, 128, %s17_s10, [#allocation3]  }
  0x13   :  { %s389_s25 = scalar_lea.hbm %s513_s1, 1536 }
  0x14   :  { %p390_p8 = scmp.ne.s32.totalorder %s513_s1, %s389_s25  ;;  %p393_p9 = scmp.lt.u32.totalorder %s389_s25, %s513_s1 }
  0x16   :  { %p395_p10 = pnand %p393_p9, %p390_p8 }
  0x18   :  { %398 = shalt.err (!%p395_p10)
}
  0x19   :  { %s399_s30 = scalar_lea.vmem %s462_s12, 1536  ;;  %p404_p12 = scmp.lt.s32.totalorder %s462_s12, %s462_s12 }
  0x1a   :  { %p400_p11 = scmp.ne.s32.totalorder %s462_s12, %s399_s30  ;;  %p405_p13 = scmp.lt.s32.totalorder %s399_s30, %s399_s30 }
  0x1c   :  { %p406_p0 = por %p405_p13, %p404_p12 }
  0x1e   :  { %p407_p1 = pnand %p406_p0, %p400_p11 }
  0x20   :  { %410 = shalt.err (!%p407_p1)
}
  0x21   :  { %s441_s0 = smov 128   ;;  %s442_s3 = smov 8  }
  0x22   :  { %31 = dma.hbm_to_vmem [thread:$0]  %s513_s1, 1536, %s462_s12, [#allocation6], %s441_s0, %s441_s0, %s442_s3  }
  0x23   :  { %433 = dma.done.wait [#allocation3], 128  }
  0x24   :  { %434 = vsyncadd [#allocation3], 4294967168 }
  0x25   :  { %435 = dma.done.wait [#allocation6], 1536  }
  0x26   :  { %436 = vsyncadd [#allocation6], 4294965760  ;;  %v443_v0 = vmov 0.0|0.0   ;;  %vm444_vm0 = vmmov 0   ;;  %v445_v1 = vmov 0.0   ;;  %v39_v2 = vld [vmem:[#allocation5] sm:$0xff] }
  0x27   :  { %341 = vmatprep.subr.bf16.mxu0 %v443_v0  ;;  %316 = vmatprep.mubr.msk.f32.mxu0 %vm444_vm0, %v445_v1  ;;  %v40_v3 = vld [vmem:[#allocation5 + $0x8] sm:$0xff]  ;;  %v41_v4 = vld [vmem:[#allocation5 + $0x10] sm:$0xff]  ;;  %v42_v6 = vld [vmem:[#allocation5 + $0x18] sm:$0xff]  ;;  %vm43_vm1 = vcmask 261120   ;;  %s446_s1 = smov [#allocation7]  }
  0x28   :  { %347 = vmatprep.subr.bf16.mxu1 %v443_v0  ;;  %327 = vmatprep.mubr.msk.f32.mxu1 %vm444_vm0, %v445_v1  ;;  %v342_v5 = vpack.c.bf16 %v40_v3, %v39_v2  ;;  %v118_v7 = vld [vmem:[#allocation5 + $0x20] sm:$0xff]  ;;  %v119_v8 = vld [vmem:[#allocation5 + $0x28] sm:$0xff]  ;;  %v120_v9 = vld [vmem:[#allocation5 + $0x30] sm:$0xff]  ;;  %v345_v11 = vpack.c.bf16 %v42_v6, %v41_v4  ;;  %s280_s6 = sshll.u32 %s446_s1, 4  ;;  %s281_s6 = int_to_ptr.vmem [resolvable:$true] %s280_s6 }
  0x29   :  { %v121_v10 = vld [vmem:[#allocation5 + $0x38] sm:$0xff]  ;;  %v348_v12 = vpack.c.bf16 %v119_v8, %v118_v7  ;;  %v196_v15 = vld [vmem:[#allocation5 + $0x40] sm:$0xff]  ;;  %v197_v16 = vld [vmem:[#allocation5 + $0x48] sm:$0xff]  ;;  %s411_s7 = scalar_lea.vmem %s281_s6, 128  ;;  %p416_p3 = scmp.lt.s32.totalorder %s281_s6, %s281_s6 }
  0x2a   :  { %343 = vmatpush3.bf16.msra.mxu0 %v342_v5  ;;  %v351_v13 = vpack.c.bf16 %v121_v10, %v120_v9  ;;  %v38_v14 = vld [vmem:[#allocation2] sm:$0xff]  ;;  %v198_v17 = vld [vmem:[#allocation5 + $0x50] sm:$0xff]  ;;  %v354_v18 = vpack.c.bf16 %v197_v16, %v196_v15  ;;  %p412_p2 = scmp.ne.s32.totalorder %s281_s6, %s411_s7  ;;  %p417_p4 = scmp.lt.s32.totalorder %s411_s7, %s411_s7 }
  0x2b   :  { %344 = vmatprep.subr.bf16.mxu0 %v443_v0  ;;  %349 = vmatpush3.bf16.msra.mxu1 %v348_v12  ;;  %v199_v19 = vld [vmem:[#allocation5 + $0x58] sm:$0xff] }
  0x2c   :  { %350 = vmatprep.subr.bf16.mxu1 %v443_v0  ;;  %v357_v20 = vpack.c.bf16 %v199_v19, %v198_v17  ;;  %p418_p5 = por %p417_p4, %p416_p3 }
  0x2e   :  { %346 = vmatpush3.bf16.msra.mxu0 %v345_v11  ;;  %p419_p6 = pnand %p418_p5, %p412_p2 }
  0x2f   :  { %353 = vmatprep.subr.bf16.mxu0 %v443_v0  ;;  %352 = vmatpush3.bf16.msra.mxu1 %v351_v13 }
  0x31   :  { %317 = vmatmul.mubr.msk.f32.vlgmr.msra.gmra.mrb[0].mxu0 %vm43_vm1, %v38_v14 }
  0x32   :  { %338 = vmatprep.mubr.msk.f32.mxu0 %vm444_vm0, %v445_v1  ;;  %355 = vmatpush3.bf16.msra.mxu0 %v354_v18 }
  0x33   :  { %356 = vmatprep.subr.bf16.mxu0 %v443_v0 }
  0x36   :  { %358 = vmatpush3.bf16.msra.mxu0 %v357_v20 }
 0x104   :  { %v113_v21 = vpop.f32.mrb[0].mxu0 }
 0x105   :  { %v318_v22 = vpop.f32.mrb[1].mxu0  ;;  %328 = vmatmul.mubr.msk.f32.vlgmr.msra.gmra.mrb[0].mxu1 %vm43_vm1, %v113_v21 }
 0x1d8   :  { %v191_v23 = vpop.f32.mrb[0].mxu1 }
 0x1d9   :  { %v329_v24 = vpop.f32.mrb[1].mxu1  ;;  %339 = vmatmul.mubr.msk.f32.vlgmr.msra.gmra.mrb[2].mxu0 %vm43_vm1, %v191_v23 }
 0x2ac   :  { %v269_v25 = vpop.f32.mrb[2].mxu0 }
 0x2ad   :  { %273 = vst.msk [vmem:[#allocation7] sm:$0xff] %vm43_vm1, %v269_v25  ;;  %v340_v26 = vpop.f32.mrb[3].mxu0 }
 0x2ae   :  { %422 = shalt.err (!%p419_p6)
}
 0x2af   :  { %s423_s10 = scalar_lea.hbm %s514_s2, 128 }
 0x2b0   :  { %p424_p7 = scmp.ne.s32.totalorder %s514_s2, %s423_s10  ;;  %p427_p8 = scmp.lt.u32.totalorder %s423_s10, %s514_s2 }
 0x2b2   :  { %p429_p9 = pnand %p427_p8, %p424_p7 }
 0x2b4   :  { %432 = shalt.err (!%p429_p9)
}
 0x2b5   :  { %283 = dma.vmem_to_hbm [thread:$0]  %s281_s6, 128, %s514_s2, [#allocation4]  }
 0x2b6   :  { %437 = dma.done.wait [#allocation4], 128  }
 0x2b7   :  { %438 = vsyncadd [#allocation4], 4294967168 }
 0x2b8   :  { %287 = vsyncpa [#allocation3], 1 }
 0x2b9   :  { %288 = vsyncpa [#allocation6], 1 }
 0x2ba   :  { %289 = vsyncpa [#allocation4], 1 }

</bundles_post_ra>
